<compile_context>
chip_gen: v7x
topology: tpu7x:2x2x1
jax: 0.10.0
libtpu: 0.0.40
codegen_flags: <defaults>
</compile_context>

<pallas_src>
from functools import partial

import jax
import jax.numpy as jnp
from jax import lax
from jax.experimental import pallas as pl
from jax.experimental.pallas import tpu as pltpu


def _bone_disc_kernel(
    x_ref,     # (TB, E)  VMEM
    w1_ref,    # (H, E)   VMEM  (LN affine folded in)
    b1_ref,    # (H, 1)   VMEM  (LN affine folded in)
    w2_ref,    # (H, H)   VMEM
    b2_ref,    # (H, 1)   VMEM
    w3_ref,    # (H, 1)   VMEM
    b3_ref,    # (1, 1)   SMEM
    out_ref,   # (1, TB)  VMEM  (lane-dense: batch on the lane axis)
    *,
    matmul_dtype,
):
    # Single early transpose: batch goes to the lane axis, features to sublanes.
    x_t = x_ref[...].astype(jnp.float32).T                    # (E, TB)

    # --- LayerNorm over features (sublane axis), eps = 1e-5; affine folded into w1/b1 ---
    mean = jnp.mean(x_t, axis=0, keepdims=True)               # (1, TB)
    centered = x_t - mean
    var = jnp.mean(centered * centered, axis=0, keepdims=True)  # biased variance
    x_hat = centered * lax.rsqrt(var + 1e-5)                  # (E, TB)

    # --- Linear(E, H) (+ folded LN affine) + LeakyReLU(0.2) ---
    h1 = jnp.dot(
        w1_ref[...].astype(matmul_dtype), x_hat.astype(matmul_dtype),
        preferred_element_type=jnp.float32,
    ) + b1_ref[...]                                            # (H, TB)
    h1 = jnp.maximum(h1, 0.2 * h1)

    # --- Linear(H, H) + LeakyReLU(0.2) ---
    h2 = jnp.dot(
        w2_ref[...].astype(matmul_dtype), h1.astype(matmul_dtype),
        preferred_element_type=jnp.float32,
    ) + b2_ref[...]                                            # (H, TB)
    h2 = jnp.maximum(h2, 0.2 * h2)

    # --- Linear(H, 1) + Sigmoid: VPU mul + sublane reduce, already lane-dense in batch ---
    logits = jnp.sum(h2 * w3_ref[...], axis=0, keepdims=True) + b3_ref[0, 0]  # (1, TB)
    out_ref[...] = jax.nn.sigmoid(logits).astype(out_ref.dtype)


def bone_discriminator(x, params, *, tile_b=None, matmul_dtype=None):
    """x: (B, num_edges) float32. params: PyTorch-layout dict (see init_params).

    matmul_dtype=None -> bf16 MXU operands (recommended; MXU is bf16-native on all TPU
    generations). Pass jnp.float32 for exact parity with the PyTorch float32 forward.
    """
    if matmul_dtype is None:
        matmul_dtype = jnp.bfloat16

    B, E = x.shape
    H = params["w1"].shape[0]

    if tile_b is None:
        cap = 2048
        if B <= 128:
            tile_b = 128
        else:
            # >= 2 grid steps so both v7x TensorCores get work under "parallel",
            # while big tiles amortize per-grid-step overhead on v5e/v6e.
            tile_b = min(cap, 128 * pl.cdiv(pl.cdiv(B, 2), 128))

    # Pad the batch instead of shrinking the tile for awkward batch sizes.
    # Zero rows are safe through LayerNorm (var=0 -> rsqrt(1e-5) finite) and sliced off.
    B_pad = tile_b * pl.cdiv(B, tile_b)
    if B_pad != B:
        x = jnp.pad(x, ((0, B_pad - B), (0, 0)))

    # --- Fold the LayerNorm affine into the first Linear (tiny host/XLA-side prep) ---
    gamma = params["gamma"].reshape(1, E)
    beta = params["beta"].reshape(E)
    w1f = params["w1"] * gamma                                   # (H, E)
    b1f = (params["w1"] @ beta + params["b1"]).reshape(H, 1)     # (H, 1)
    b2c = params["b2"].reshape(H, 1)
    w3c = params["w3"].reshape(H, 1)
    b3s = params["b3"].reshape(1, 1)

    grid = (B_pad // tile_b,)

    def whole(shape):
        # small parameter arrays stay resident across the whole grid
        return pl.BlockSpec(shape, lambda i, _s=shape: tuple(0 for _ in _s))

    out_row = pl.pallas_call(
        partial(_bone_disc_kernel, matmul_dtype=matmul_dtype),
        out_shape=jax.ShapeDtypeStruct((1, B_pad), jnp.float32),
        grid=grid,
        in_specs=[
            pl.BlockSpec((tile_b, E), lambda i: (i, 0)),          # x tile
            whole((H, E)),                                        # w1 (folded)
            whole((H, 1)),                                        # b1 (folded)
            whole((H, H)),                                        # w2
            whole((H, 1)),                                        # b2
            whole((H, 1)),                                        # w3 column
            pl.BlockSpec((1, 1), lambda i: (0, 0),
                         memory_space=pltpu.MemorySpace.SMEM),    # b3 scalar
        ],
        out_specs=pl.BlockSpec((1, tile_b), lambda i: (0, i)),    # lane-dense output
        compiler_params=pltpu.CompilerParams(
            dimension_semantics=("parallel",),
        ),
    )(x, w1f, b1f, w2f := params["w2"], b2c, w3c, b3s)

    # (1, B_pad) -> (B, 1): slice off batch padding.
    return out_row[0, :B].reshape(B, 1)


def init_params(key, num_edges, hidden_dim):
    """Deterministic synthetic parameters in PyTorch-native layout/shapes."""
    k1, k2, k3, k4, k5, k6, k7, k8 = jax.random.split(key, 8)
    s1 = 1.0 / jnp.sqrt(num_edges)
    s2 = 1.0 / jnp.sqrt(hidden_dim)
    return {
        # LayerNorm(num_edges) affine (randomized here to exercise the fold)
        "gamma": jax.random.uniform(k7, (num_edges,), jnp.float32, 0.5, 1.5),
        "beta": jax.random.uniform(k8, (num_edges,), jnp.float32, -0.5, 0.5),
        # Linear weights in PyTorch (out, in) layout, biases (out,)
        "w1": jax.random.uniform(k1, (hidden_dim, num_edges), jnp.float32, -s1, s1),
        "b1": jax.random.uniform(k4, (hidden_dim,), jnp.float32, -s1, s1),
        "w2": jax.random.uniform(k2, (hidden_dim, hidden_dim), jnp.float32, -s2, s2),
        "b2": jax.random.uniform(k5, (hidden_dim,), jnp.float32, -s2, s2),
        "w3": jax.random.uniform(k3, (1, hidden_dim), jnp.float32, -s2, s2),
        "b3": jax.random.uniform(k6, (1,), jnp.float32, -s2, s2),
    }


def reference_forward(x, p):
    """Pure-JAX reference mirroring the PyTorch forward exactly (f32)."""
    mean = jnp.mean(x, axis=-1, keepdims=True)
    var = jnp.mean((x - mean) ** 2, axis=-1, keepdims=True)
    xh = (x - mean) / jnp.sqrt(var + 1e-5) * p["gamma"] + p["beta"]
    h1 = xh @ p["w1"].T + p["b1"]
    h1 = jnp.where(h1 >= 0, h1, 0.2 * h1)
    h2 = h1 @ p["w2"].T + p["b2"]
    h2 = jnp.where(h2 >= 0, h2, 0.2 * h2)
    h3 = h2 @ p["w3"].T + p["b3"]
    return jax.nn.sigmoid(h3)


if __name__ == "__main__":
    NUM_EDGES = 32
    HIDDEN_DIM = 128   # module default
    BATCH = 16

    key = jax.random.PRNGKey(0)
    kx, kp = jax.random.split(key)

    x = jax.random.normal(kx, (BATCH, NUM_EDGES), jnp.float32)
    params = init_params(kp, NUM_EDGES, HIDDEN_DIM)

    ref = reference_forward(x, params)

    # Exact-parity path (f32 MXU operands).
    out_f32 = jax.block_until_ready(bone_discriminator(x, params, matmul_dtype=jnp.float32))
    assert out_f32.shape == (BATCH, 1)
    assert jnp.allclose(out_f32, ref, atol=1e-4, rtol=1e-4), "f32 path mismatch vs reference"

    # Default fast path (bf16 MXU operands, f32 accumulation) -- looser tolerance.
    out_bf16 = jax.block_until_ready(bone_discriminator(x, params))
    assert out_bf16.shape == (BATCH, 1)
    assert jnp.allclose(out_bf16, ref, atol=5e-2, rtol=5e-2), "bf16 path mismatch vs reference"

    print("KERNEL_OK")
</pallas_src>

<mosaic_0001>
module attributes {stable_mosaic.version = 11 : i64} {
  func.func @_bone_disc_kernel(%arg0: i32, %arg1: memref<128x32xf32, #tpu.memory_space<vmem>>, %arg2: memref<128x32xf32, #tpu.memory_space<vmem>>, %arg3: memref<128x1xf32, #tpu.memory_space<vmem>>, %arg4: memref<128x128xf32, #tpu.memory_space<vmem>>, %arg5: memref<128x1xf32, #tpu.memory_space<vmem>>, %arg6: memref<128x1xf32, #tpu.memory_space<vmem>>, %arg7: memref<1x1xf32, #tpu.memory_space<smem>>, %arg8: memref<1x128xf32, #tpu.memory_space<vmem>>) attributes {dimension_semantics = [#tpu.dimension_semantics<parallel>], iteration_bounds = array<i64: 1>, scalar_prefetch = 0 : i64, scratch_operands = 0 : i64, tpu.core_type = #tpu.core_type<tc>, window_params = [{transform_indices = @transform_0, window_bounds = array<i64: 128, 32>}, {pipeline_mode = #tpu.pipeline_mode<synchronous>, transform_indices = @transform_1, window_bounds = array<i64: 128, 32>}, {pipeline_mode = #tpu.pipeline_mode<synchronous>, transform_indices = @transform_2, window_bounds = array<i64: 128, 1>}, {pipeline_mode = #tpu.pipeline_mode<synchronous>, transform_indices = @transform_3, window_bounds = array<i64: 128, 128>}, {pipeline_mode = #tpu.pipeline_mode<synchronous>, transform_indices = @transform_4, window_bounds = array<i64: 128, 1>}, {pipeline_mode = #tpu.pipeline_mode<synchronous>, transform_indices = @transform_5, window_bounds = array<i64: 128, 1>}, {transform_indices = @transform_6, window_bounds = array<i64: 1, 1>}, {transform_indices = @transform_7, window_bounds = array<i64: 1, 128>}]} {
    %c0 = arith.constant 0 : index
    %c0_0 = arith.constant 0 : index
    %0 = vector.load %arg1[%c0, %c0_0] : memref<128x32xf32, #tpu.memory_space<vmem>>, vector<128x32xf32>
    %1 = tpu.transpose %0, [1, 0] : vector<128x32xf32> -> vector<32x128xf32>
    %cst = arith.constant dense<0.000000e+00> : vector<128xf32>
    %2 = vector.multi_reduction <add>, %1, %cst [0] : vector<32x128xf32> to vector<128xf32>
    %3 = vector.shape_cast %2 : vector<128xf32> to vector<1x128xf32>
    %cst_1 = arith.constant 3.200000e+01 : f32
    %4 = vector.broadcast %cst_1 : f32 to vector<1x128xf32>
    %5 = arith.divf %3, %4 : vector<1x128xf32>
    %6 = vector.broadcast %5 : vector<1x128xf32> to vector<32x128xf32>
    %7 = arith.subf %1, %6 : vector<32x128xf32>
    %8 = arith.mulf %7, %7 : vector<32x128xf32>
    %cst_2 = arith.constant dense<0.000000e+00> : vector<128xf32>
    %9 = vector.multi_reduction <add>, %8, %cst_2 [0] : vector<32x128xf32> to vector<128xf32>
    %10 = vector.shape_cast %9 : vector<128xf32> to vector<1x128xf32>
    %cst_3 = arith.constant 3.200000e+01 : f32
    %11 = vector.broadcast %cst_3 : f32 to vector<1x128xf32>
    %12 = arith.divf %10, %11 : vector<1x128xf32>
    %cst_4 = arith.constant 9.99999974E-6 : f32
    %13 = vector.broadcast %cst_4 : f32 to vector<1x128xf32>
    %14 = arith.addf %12, %13 : vector<1x128xf32>
    %15 = math.rsqrt %14 : vector<1x128xf32>
    %16 = vector.broadcast %15 : vector<1x128xf32> to vector<32x128xf32>
    %17 = arith.mulf %7, %16 : vector<32x128xf32>
    %c0_5 = arith.constant 0 : index
    %c0_6 = arith.constant 0 : index
    %18 = vector.load %arg2[%c0_5, %c0_6] : memref<128x32xf32, #tpu.memory_space<vmem>>, vector<128x32xf32>
    %cst_7 = arith.constant dense<0.000000e+00> : vector<128x128xf32>
    %19 = tpu.matmul %18, %17, %cst_7 {dimension_numbers = #tpu.dot_dimension_numbers<[1], [0], [0], [1], [0, 0, 1, 1], [], []>} : vector<128x32xf32>, vector<32x128xf32>, vector<128x128xf32> -> vector<128x128xf32>
    %c0_8 = arith.constant 0 : index
    %c0_9 = arith.constant 0 : index
    %20 = vector.load %arg3[%c0_8, %c0_9] : memref<128x1xf32, #tpu.memory_space<vmem>>, vector<128x1xf32>
    %21 = vector.broadcast %20 : vector<128x1xf32> to vector<128x128xf32>
    %22 = arith.addf %19, %21 : vector<128x128xf32>
    %cst_10 = arith.constant 2.000000e-01 : f32
    %23 = vector.broadcast %cst_10 : f32 to vector<128x128xf32>
    %24 = arith.mulf %23, %22 : vector<128x128xf32>
    %25 = arith.maximumf %22, %24 : vector<128x128xf32>
    %c0_11 = arith.constant 0 : index
    %c0_12 = arith.constant 0 : index
    %26 = vector.load %arg4[%c0_11, %c0_12] : memref<128x128xf32, #tpu.memory_space<vmem>>, vector<128x128xf32>
    %cst_13 = arith.constant dense<0.000000e+00> : vector<128x128xf32>
    %27 = tpu.matmul %26, %25, %cst_13 {dimension_numbers = #tpu.dot_dimension_numbers<[1], [0], [0], [1], [0, 0, 1, 1], [], []>} : vector<128x128xf32>, vector<128x128xf32>, vector<128x128xf32> -> vector<128x128xf32>
    %c0_14 = arith.constant 0 : index
    %c0_15 = arith.constant 0 : index
    %28 = vector.load %arg5[%c0_14, %c0_15] : memref<128x1xf32, #tpu.memory_space<vmem>>, vector<128x1xf32>
    %29 = vector.broadcast %28 : vector<128x1xf32> to vector<128x128xf32>
    %30 = arith.addf %27, %29 : vector<128x128xf32>
    %cst_16 = arith.constant 2.000000e-01 : f32
    %31 = vector.broadcast %cst_16 : f32 to vector<128x128xf32>
    %32 = arith.mulf %31, %30 : vector<128x128xf32>
    %33 = arith.maximumf %30, %32 : vector<128x128xf32>
    %c0_17 = arith.constant 0 : index
    %c0_18 = arith.constant 0 : index
    %34 = vector.load %arg6[%c0_17, %c0_18] : memref<128x1xf32, #tpu.memory_space<vmem>>, vector<128x1xf32>
    %35 = vector.broadcast %34 : vector<128x1xf32> to vector<128x128xf32>
    %36 = arith.mulf %33, %35 : vector<128x128xf32>
    %cst_19 = arith.constant dense<0.000000e+00> : vector<128xf32>
    %37 = vector.multi_reduction <add>, %36, %cst_19 [0] : vector<128x128xf32> to vector<128xf32>
    %38 = vector.shape_cast %37 : vector<128xf32> to vector<1x128xf32>
    %c0_20 = arith.constant 0 : index
    %c0_21 = arith.constant 0 : index
    %39 = memref.load %arg7[%c0_20, %c0_21] : memref<1x1xf32, #tpu.memory_space<smem>>
    %40 = vector.broadcast %39 : f32 to vector<1x128xf32>
    %41 = arith.addf %38, %40 : vector<1x128xf32>
    %42 = arith.negf %41 : vector<1x128xf32>
    %43 = math.exp %42 : vector<1x128xf32>
    %cst_22 = arith.constant 1.000000e+00 : f32
    %44 = vector.broadcast %cst_22 : f32 to vector<1x128xf32>
    %45 = arith.addf %44, %43 : vector<1x128xf32>
    %46 = arith.divf %44, %45 : vector<1x128xf32>
    %c0_23 = arith.constant 0 : index
    %c0_24 = arith.constant 0 : index
    %47 = vector.load %arg8[%c0_23, %c0_24] : memref<1x128xf32, #tpu.memory_space<vmem>>, vector<1x128xf32>
    tpu.vector_store %arg8[%c0_23, %c0_24], %46 {strides = array<i32>} : memref<1x128xf32, #tpu.memory_space<vmem>>, vector<1x128xf32>,
    return
  }
  func.func @transform_0(%arg0: i32) -> (i32, i32) {
    %c0_i32 = arith.constant 0 : i32
    %c0_i32_0 = arith.constant 0 : i32
    return %arg0, %c0_i32 : i32, i32
  }
  func.func @transform_1(%arg0: i32) -> (i32, i32) {
    %c0_i32 = arith.constant 0 : i32
    %c0_i32_0 = arith.constant 0 : i32
    %c0_i32_1 = arith.constant 0 : i32
    return %c0_i32, %c0_i32_0 : i32, i32
  }
  func.func @transform_2(%arg0: i32) -> (i32, i32) {
    %c0_i32 = arith.constant 0 : i32
    %c0_i32_0 = arith.constant 0 : i32
    %c0_i32_1 = arith.constant 0 : i32
    return %c0_i32, %c0_i32_0 : i32, i32
  }
  func.func @transform_3(%arg0: i32) -> (i32, i32) {
    %c0_i32 = arith.constant 0 : i32
    %c0_i32_0 = arith.constant 0 : i32
    %c0_i32_1 = arith.constant 0 : i32
    return %c0_i32, %c0_i32_0 : i32, i32
  }
  func.func @transform_4(%arg0: i32) -> (i32, i32) {
    %c0_i32 = arith.constant 0 : i32
    %c0_i32_0 = arith.constant 0 : i32
    %c0_i32_1 = arith.constant 0 : i32
    return %c0_i32, %c0_i32_0 : i32, i32
  }
  func.func @transform_5(%arg0: i32) -> (i32, i32) {
    %c0_i32 = arith.constant 0 : i32
    %c0_i32_0 = arith.constant 0 : i32
    %c0_i32_1 = arith.constant 0 : i32
    return %c0_i32, %c0_i32_0 : i32, i32
  }
  func.func @transform_6(%arg0: i32) -> (i32, i32) {
    %c0_i32 = arith.constant 0 : i32
    %c0_i32_0 = arith.constant 0 : i32
    %c0_i32_1 = arith.constant 0 : i32
    return %c0_i32, %c0_i32_0 : i32, i32
  }
  func.func @transform_7(%arg0: i32) -> (i32, i32) {
    %c0_i32 = arith.constant 0 : i32
    %c0_i32_0 = arith.constant 0 : i32
    return %c0_i32, %arg0 : i32, i32
  }
}

</mosaic_0001>

<bundles_post_ra>
// kernel: tpu_custom_call.1
= control target key start
LH: loop header
LB: loop body
LE: loop exit
PB: predicated region body
PF: predicated region fallthrough
CT: control target
= control target key end

     0   :  { %v1142_v1 = vmov 0   ;;  %s1520_s0 = inlined_call_operand.vmem [shape: f32[128,32], index: 0, kind: input, shape index: {}]   ;;  %s1521_s1 = inlined_call_operand.vmem [shape: f32[128,32], index: 1, kind: input, shape index: {}]   ;;  %s1522_s2 = inlined_call_operand.vmem [shape: f32[128,1], index: 2, kind: input, shape index: {}]   ;;  %s1523_s3 = inlined_call_operand.vmem [shape: f32[128,128], index: 3, kind: input, shape index: {}]   ;;  %s1524_s4 = inlined_call_operand.vmem [shape: f32[128,1], index: 4, kind: input, shape index: {}]   ;;  %s1525_s5 = inlined_call_operand.vmem [shape: f32[128,1], index: 5, kind: input, shape index: {}]   ;;  %s1526_s6 = inlined_call_operand.<no memory space> [shape: f32[1,1], index: 6, kind: input, shape index: {}]   ;;  %s1527_s7 = inlined_call_operand.hbm [shape: f32[1,128], index: 7, kind: output, shape index: {}]  }
   0x1   :  { %v28_v0 = vld [vmem:[%s1520_s0] sm:$0xff]  ;;  %1110 = vset.pattern.permute.xlu1 %v1142_v1  ;;  %v29_v2 = vld [vmem:[%s1520_s0 + $0x8] sm:$0xff]  ;;  %v30_v4 = vld [vmem:[%s1520_s0 + $0x10] sm:$0xff] }
   0x2   :  { %44 = vxpose.xlu0.b32.start [1/16] (narrow) %v28_v0, 32  ;;  %v127_v3 = vld [vmem:[%s1522_s2] sm:$0xff]  ;;  %v128_v5 = vld [vmem:[%s1522_s2 + $0x8] sm:$0xff] }
   0x3   :  { %145 = vperm.xlu1 %1110, %v127_v3  }
   0x6   :  { %45 = vxpose.xlu0.b32.cont [2/16] (narrow) %v29_v2, 32 }
   0x7   :  { %13 = vsyncpa [#allocation4], 0  ;;  %v31_v6 = vld [vmem:[%s1520_s0 + $0x18] sm:$0xff]  ;;  %150 = vperm.xlu1 %1110, %v128_v5   ;;  %v129_v7 = vld [vmem:[%s1522_s2 + $0x10] sm:$0xff]  ;;  %vm223_vm0 = vcmask 261120   ;;  %s1143_s17 = smov [#allocation3]  }
   0x8   :  { %v32_v8 = vld [vmem:[%s1520_s0 + $0x20] sm:$0xff]  ;;  %v130_v9 = vld [vmem:[%s1522_s2 + $0x18] sm:$0xff]  ;;  %v33_v10 = vld [vmem:[%s1520_s0 + $0x28] sm:$0xff]  ;;  %s887_s18 = sshll.u32 %s1143_s17, 4  ;;  %s888_s18 = int_to_ptr.vmem [resolvable:$true] %s887_s18 }
   0x9   :  { %v131_v11 = vld [vmem:[%s1522_s2 + $0x20] sm:$0xff]  ;;  %v34_v12 = vld [vmem:[%s1520_s0 + $0x30] sm:$0xff]  ;;  %v132_v13 = vld [vmem:[%s1522_s2 + $0x28] sm:$0xff]  ;;  %s1118_s19 = scalar_lea.vmem %s888_s18, 16  ;;  %s1122_s20 = scalar_lea.vmem %s888_s18, 32 }
   0xa   :  { %46 = vxpose.xlu0.b32.cont [3/16] (narrow) %v30_v4, 32  ;;  %v35_v14 = vld [vmem:[%s1520_s0 + $0x38] sm:$0xff]  ;;  %v133_v15 = vld [vmem:[%s1522_s2 + $0x30] sm:$0xff]  ;;  %v36_v16 = vld [vmem:[%s1520_s0 + $0x40] sm:$0xff]  ;;  %p1119_p0 = scmp.ne.s32.totalorder %s888_s18, %s1118_s19  ;;  %p1123_p1 = scmp.lt.s32.totalorder %s888_s18, %s888_s18 }
   0xb   :  { %155 = vperm.xlu1 %1110, %v129_v7   ;;  %v134_v17 = vld [vmem:[%s1522_s2 + $0x38] sm:$0xff]  ;;  %v37_v18 = vld [vmem:[%s1520_s0 + $0x48] sm:$0xff]  ;;  %v135_v19 = vld [vmem:[%s1522_s2 + $0x40] sm:$0xff]  ;;  %p1124_p2 = scmp.lt.s32.totalorder %s1122_s20, %s1118_s19 }
   0xc   :  { %v38_v20 = vld [vmem:[%s1520_s0 + $0x50] sm:$0xff]  ;;  %v136_v21 = vld [vmem:[%s1522_s2 + $0x48] sm:$0xff]  ;;  %v39_v22 = vld [vmem:[%s1520_s0 + $0x58] sm:$0xff] }
   0xd   :  { %v137_v23 = vld [vmem:[%s1522_s2 + $0x50] sm:$0xff]  ;;  %v40_v24 = vld [vmem:[%s1520_s0 + $0x60] sm:$0xff]  ;;  %v138_v25 = vld [vmem:[%s1522_s2 + $0x58] sm:$0xff]  ;;  %p1125_p3 = por %p1124_p2, %p1123_p1 }
   0xe   :  { %47 = vxpose.xlu0.b32.cont [4/16] (narrow) %v31_v6, 32  ;;  %v41_v26 = vld [vmem:[%s1520_s0 + $0x68] sm:$0xff]  ;;  %v139_v27 = vld [vmem:[%s1522_s2 + $0x60] sm:$0xff]  ;;  %v42_v28 = vld [vmem:[%s1520_s0 + $0x70] sm:$0xff] }
   0xf   :  { %160 = vperm.xlu1 %1110, %v130_v9   ;;  %v140_v29 = vld [vmem:[%s1522_s2 + $0x68] sm:$0xff]  ;;  %v43_v30 = vld [vmem:[%s1520_s0 + $0x78] sm:$0xff]  ;;  %v141_v31 = vld [vmem:[%s1522_s2 + $0x70] sm:$0xff]  ;;  %p1126_p4 = pnand %p1125_p3, %p1119_p0 }
  0x10   :  { %v142_v32 = vld [vmem:[%s1522_s2 + $0x78] sm:$0xff]  ;;  %v466_v33 = vld [vmem:[%s1524_s4 + $0x8] sm:$0xff]  ;;  %v467_v34 = vld [vmem:[%s1524_s4 + $0x10] sm:$0xff] }
  0x11   :  { %v468_v35 = vld [vmem:[%s1524_s4 + $0x18] sm:$0xff]  ;;  %v111_v36 = vld [vmem:[%s1521_s1] sm:$0xff]  ;;  %v739_v39 = vld [vmem:[%s1525_s5 + $0x8] sm:$0xff] }
  0x12   :  { %48 = vxpose.xlu0.b32.cont [5/16] (narrow) %v32_v8, 32  ;;  %972 = vmatprep.mubr.msk.f32.mxu0 %vm223_vm0, %v111_v36  ;;  %v469_v37 = vld [vmem:[%s1524_s4 + $0x20] sm:$0xff]  ;;  %v470_v40 = vld [vmem:[%s1524_s4 + $0x28] sm:$0xff]  ;;  %v740_v41 = vld [vmem:[%s1525_s5 + $0x10] sm:$0xff] }
  0x13   :  { %165 = vperm.xlu1 %1110, %v131_v11   ;;  %v738_v38 = vld [vmem:[%s1525_s5] sm:$0xff]  ;;  %v471_v42 = vld [vmem:[%s1524_s4 + $0x30] sm:$0xff]  ;;  %v741_v43 = vld [vmem:[%s1525_s5 + $0x18] sm:$0xff] }
  0x14   :  { %v472_v44 = vld [vmem:[%s1524_s4 + $0x38] sm:$0xff]  ;;  %v473_v45 = vld [vmem:[%s1524_s4 + $0x40] sm:$0xff]  ;;  %v474_v46 = vld [vmem:[%s1524_s4 + $0x48] sm:$0xff] }
  0x15   :  { %v475_v47 = vld [vmem:[%s1524_s4 + $0x50] sm:$0xff]  ;;  %v476_v48 = vld [vmem:[%s1524_s4 + $0x58] sm:$0xff]  ;;  %v477_v49 = vld [vmem:[%s1524_s4 + $0x60] sm:$0xff] }
  0x16   :  { %49 = vxpose.xlu0.b32.cont [6/16] (narrow) %v33_v10, 32  ;;  %v478_v51 = vld [vmem:[%s1524_s4 + $0x68] sm:$0xff]  ;;  %v479_v53 = vld [vmem:[%s1524_s4 + $0x70] sm:$0xff]  ;;  %v480_v56 = vld [vmem:[%s1524_s4 + $0x78] sm:$0xff] }
  0x17   :  { %170 = vperm.xlu1 %1110, %v132_v13   ;;  %v751_v60 = vld [vmem:[%s1525_s5 + $0x68] sm:$0xff]  ;;  %v753_v63 = vld [vmem:[%s1525_s5 + $0x78] sm:$0xff]  ;;  %v117_v36 = vld [vmem:[%s1521_s1 + $0x30] sm:$0xff] }
  0x1a   :  { %50 = vxpose.xlu0.b32.cont [7/16] (narrow) %v34_v12, 32 }
  0x1b   :  { %175 = vperm.xlu1 %1110, %v133_v15  }
  0x1e   :  { %51 = vxpose.xlu0.b32.cont [8/16] (narrow) %v35_v14, 32 }
  0x1f   :  { %180 = vperm.xlu1 %1110, %v134_v17  }
  0x22   :  { %52 = vxpose.xlu0.b32.cont [9/16] (narrow) %v36_v16, 32 }
  0x23   :  { %185 = vperm.xlu1 %1110, %v135_v19  }
  0x26   :  { %53 = vxpose.xlu0.b32.cont [10/16] (narrow) %v37_v18, 32 }
  0x27   :  { %190 = vperm.xlu1 %1110, %v136_v21  }
  0x2a   :  { %54 = vxpose.xlu0.b32.cont [11/16] (narrow) %v38_v20, 32 }
  0x2b   :  { %195 = vperm.xlu1 %1110, %v137_v23  }
  0x2e   :  { %55 = vxpose.xlu0.b32.cont [12/16] (narrow) %v39_v22, 32 }
  0x2f   :  { %200 = vperm.xlu1 %1110, %v138_v25  }
  0x32   :  { %56 = vxpose.xlu0.b32.cont [13/16] (narrow) %v40_v24, 32 }
  0x33   :  { %205 = vperm.xlu1 %1110, %v139_v27  }
  0x36   :  { %57 = vxpose.xlu0.b32.cont [14/16] (narrow) %v41_v26, 32 }
  0x37   :  { %210 = vperm.xlu1 %1110, %v140_v29  }
  0x3a   :  { %58 = vxpose.xlu0.b32.cont [15/16] (narrow) %v42_v28, 32 }
  0x3b   :  { %215 = vperm.xlu1 %1110, %v141_v31   ;;  %v112_v31 = vld [vmem:[%s1521_s1 + $0x8] sm:$0xff] }
  0x3e   :  { %59 = vxpose.xlu0.b32.end [16/16] (narrow) %v43_v30, 32 }
  0x3f   :  { %220 = vperm.xlu1 %1110, %v142_v32   ;;  %v113_v32 = vld [vmem:[%s1521_s1 + $0x10] sm:$0xff] }
  0x43   :  { %488 = vperm.xlu1 %1110, %v466_v33   ;;  %v114_v33 = vld [vmem:[%s1521_s1 + $0x18] sm:$0xff] }
  0x47   :  { %493 = vperm.xlu1 %1110, %v467_v34   ;;  %v115_v34 = vld [vmem:[%s1521_s1 + $0x20] sm:$0xff] }
  0x4b   :  { %498 = vperm.xlu1 %1110, %v468_v35   ;;  %v116_v35 = vld [vmem:[%s1521_s1 + $0x28] sm:$0xff] }
  0x4f   :  { %503 = vperm.xlu1 %1110, %v469_v37   ;;  %v118_v37 = vld [vmem:[%s1521_s1 + $0x38] sm:$0xff] }
  0x53   :  { %756 = vperm.xlu1 %1110, %v738_v38   ;;  %v119_v38 = vld [vmem:[%s1521_s1 + $0x40] sm:$0xff] }
  0x57   :  { %761 = vperm.xlu1 %1110, %v739_v39   ;;  %v120_v39 = vld [vmem:[%s1521_s1 + $0x48] sm:$0xff] }
  0x5b   :  { %508 = vperm.xlu1 %1110, %v470_v40   ;;  %v121_v40 = vld [vmem:[%s1521_s1 + $0x50] sm:$0xff] }
  0x5f   :  { %766 = vperm.xlu1 %1110, %v740_v41   ;;  %v122_v41 = vld [vmem:[%s1521_s1 + $0x58] sm:$0xff] }
  0x63   :  { %513 = vperm.xlu1 %1110, %v471_v42   ;;  %v123_v42 = vld [vmem:[%s1521_s1 + $0x60] sm:$0xff] }
  0x67   :  { %1111 = vset.pattern.permute.xlu0 %v1142_v1  ;;  %771 = vperm.xlu1 %1110, %v741_v43   ;;  %v124_v43 = vld [vmem:[%s1521_s1 + $0x68] sm:$0xff] }
  0x6b   :  { %518 = vperm.xlu1 %1110, %v472_v44   ;;  %v125_v44 = vld [vmem:[%s1521_s1 + $0x70] sm:$0xff] }
  0x6f   :  { %523 = vperm.xlu1 %1110, %v473_v45   ;;  %v126_v45 = vld [vmem:[%s1521_s1 + $0x78] sm:$0xff] }
  0x73   :  { %528 = vperm.xlu1 %1110, %v474_v46   ;;  %v449_v46 = vld [vmem:[%s1523_s3] sm:$0xff] }
  0x77   :  { %533 = vperm.xlu1 %1110, %v475_v47   ;;  %v455_v47 = vld [vmem:[%s1523_s3 + $0x30] sm:$0xff] }
  0x78   :  { %1037 = vmatprep.mubr.f32.mxu1 %v455_v47 }
  0x7b   :  { %538 = vperm.xlu1 %1110, %v476_v48   ;;  %v465_v48 = vld [vmem:[%s1524_s4] sm:$0xff] }
  0x7c   :  { %483 = vperm.xlu0 %1111, %v465_v48  }
  0x7f   :  { %543 = vperm.xlu1 %1110, %v477_v49   ;;  %v742_v49 = vld [vmem:[%s1525_s5 + $0x20] sm:$0xff] }
  0x80   :  { %776 = vperm.xlu0 %1111, %v742_v49  }
  0x82   :  { %v60_v50 = vpop.trf.xlu0 }
  0x83   :  { %548 = vperm.xlu1 %1110, %v478_v51   ;;  %v146_v51 = vpop.permute.xlu1 %145 }
  0x86   :  { %v61_v52 = vpop.trf.xlu0 }
  0x87   :  { %v76_v55 = vadd.f32 %v61_v52, %v60_v50  ;;  %553 = vperm.xlu1 %1110, %v479_v53   ;;  %v151_v53 = vpop.permute.xlu1 %150 }
  0x8a   :  { %v62_v54 = vpop.trf.xlu0 }
  0x8b   :  { %v77_v57 = vadd.f32 %v76_v55, %v62_v54  ;;  %558 = vperm.xlu1 %1110, %v480_v56   ;;  %v746_v55 = vld [vmem:[%s1525_s5 + $0x40] sm:$0xff]  ;;  %v156_v56 = vpop.permute.xlu1 %155 }
  0x8e   :  { %v63_v58 = vpop.trf.xlu0 }
  0x8f   :  { %v78_v59 = vadd.f32 %v77_v57, %v63_v58  ;;  %821 = vperm.xlu1 %1110, %v751_v60   ;;  %v747_v57 = vld [vmem:[%s1525_s5 + $0x48] sm:$0xff]  ;;  %v749_v60 = vld [vmem:[%s1525_s5 + $0x58] sm:$0xff] }
  0x91   :  { %v79_v61 = vrot.slane %v78_v59, 4 }
  0x93   :  { %v80_v62 = vadd.f32 %v79_v61, %v78_v59  ;;  %831 = vperm.xlu1 %1110, %v753_v63   ;;  %v748_v59 = vld [vmem:[%s1525_s5 + $0x50] sm:$0xff] }
  0x95   :  { %v81_v0 = vrot.slane %v80_v62, 2 }
  0x97   :  { %v82_v1 = vadd.f32 %v81_v0, %v80_v62  ;;  %v750_v62 = vld [vmem:[%s1525_s5 + $0x60] sm:$0xff]  ;;  %v752_v0 = vld [vmem:[%s1525_s5 + $0x70] sm:$0xff] }
  0x99   :  { %v83_v2 = vrot.slane %v82_v1, 1 }
  0x9b   :  { %v84_v3 = vadd.f32 %v83_v2, %v82_v1 }
  0x9d   :  { %v86_v4 = vmul.f32 0.03125, %v84_v3 }
  0x9f   :  { %v87_v5 = vsub.f32 %v60_v50, %v86_v4  ;;  %v88_v6 = vsub.f32 %v61_v52, %v86_v4  ;;  %v89_v7 = vsub.f32 %v62_v54, %v86_v4  ;;  %v90_v8 = vsub.f32 %v63_v58, %v86_v4  ;;  %v743_v50 = vld [vmem:[%s1525_s5 + $0x28] sm:$0xff]  ;;  %v744_v52 = vld [vmem:[%s1525_s5 + $0x30] sm:$0xff]  ;;  %v745_v54 = vld [vmem:[%s1525_s5 + $0x38] sm:$0xff]  ;;  %v161_v58 = vpop.permute.xlu1 %160 }
  0xa0   :  { %781 = vperm.xlu0 %1111, %v743_v50  }
  0xa1   :  { %v91_v9 = vmul.f32 %v87_v5, %v87_v5  ;;  %v92_v10 = vmul.f32 %v88_v6, %v88_v6  ;;  %v93_v11 = vmul.f32 %v89_v7, %v89_v7  ;;  %v94_v13 = vmul.f32 %v90_v8, %v90_v8 }
  0xa3   :  { %v95_v12 = vadd.f32 %v92_v10, %v91_v9  ;;  %v166_v61 = vpop.permute.xlu1 %165 }
  0xa4   :  { %786 = vperm.xlu0 %1111, %v744_v52  }
  0xa5   :  { %v96_v14 = vadd.f32 %v95_v12, %v93_v11 }
  0xa7   :  { %v97_v15 = vadd.f32 %v96_v14, %v94_v13  ;;  %v171_v63 = vpop.permute.xlu1 %170 }
  0xa8   :  { %791 = vperm.xlu0 %1111, %v745_v54  }
  0xa9   :  { %v98_v16 = vrot.slane %v97_v15, 4 }
  0xab   :  { %v99_v17 = vadd.f32 %v98_v16, %v97_v15  ;;  %v176_v1 = vpop.permute.xlu1 %175 }
  0xac   :  { %796 = vperm.xlu0 %1111, %v746_v55  }
  0xad   :  { %v100_v18 = vrot.slane %v99_v17, 2 }
  0xaf   :  { %v101_v19 = vadd.f32 %v100_v18, %v99_v17  ;;  %v181_v2 = vpop.permute.xlu1 %180 }
  0xb0   :  { %801 = vperm.xlu0 %1111, %v747_v57  }
  0xb1   :  { %v102_v20 = vrot.slane %v101_v19, 1 }
  0xb3   :  { %v103_v21 = vadd.f32 %v102_v20, %v101_v19  ;;  %v186_v3 = vpop.permute.xlu1 %185 }
  0xb4   :  { %806 = vperm.xlu0 %1111, %v748_v59  }
  0xb5   :  { %v104_v22 = vmul.f32 0.03125, %v103_v21 }
  0xb7   :  { %v105_v23 = vadd.f32 1e-05, %v104_v22  ;;  %v191_v4 = vpop.permute.xlu1 %190 }
  0xb8   :  { %811 = vperm.xlu0 %1111, %v749_v60  }
  0xb9   :  { %1112 = vrsqrt.f32 %v105_v23 }
  0xbc   :  { %816 = vperm.xlu0 %1111, %v750_v62  }
  0xc0   :  { %826 = vperm.xlu0 %1111, %v752_v0  }
  0xc3   :  { %v1113_v24 = vpop.eup %1112 }
  0xc4   :  { %v110_v25 = vmul.f32 %v1113_v24, %v90_v8  ;;  %v107_v26 = vmul.f32 %v1113_v24, %v87_v5  ;;  %v108_v27 = vmul.f32 %v1113_v24, %v88_v6  ;;  %v109_v28 = vmul.f32 %v1113_v24, %v89_v7  ;;  %v1448_v5 = vpop.permute.xlu1 %195 }
  0xc6   :  { %v1052_v29 = vpack.c.bf16 %v108_v27, %v107_v26  ;;  %v1056_v30 = vpack.c.bf16 %v110_v25, %v109_v28 }
  0xc8   :  { %1053 = vmatprep.subr.bf16.mxu0 %v1052_v29  ;;  %v201_v11 = vpop.permute.xlu1 %200 }
  0xc9   :  { %1055 = vmatpush3.bf16.msra.mxu0 %v1052_v29 }
  0xca   :  { %1057 = vmatprep.subr.bf16.mxu0 %v1056_v30 }
  0xcc   :  { %v206_v26 = vpop.permute.xlu1 %205 }
  0xcd   :  { %1059 = vmatpush3.bf16.msra.mxu0 %v1056_v30 }
  0xd0   :  { %973 = vmatmul.mubr.msk.f32.vlgmr.msra.gmra.mrb[0].mxu0 %vm223_vm0, %v112_v31 }
  0xd1   :  { %975 = vmatprep.mubr.msk.f32.mxu0 %vm223_vm0, %v113_v32 }
  0xd4   :  { %976 = vmatmul.mubr.msk.f32.gmra.mrb[2].mxu0 %vm223_vm0, %v114_v33 }
  0xd5   :  { %978 = vmatprep.mubr.msk.f32.mxu0 %vm223_vm0, %v115_v34 }
  0xd8   :  { %979 = vmatmul.mubr.msk.f32.gmra.mrb[4].mxu0 %vm223_vm0, %v116_v35 }
  0xd9   :  { %981 = vmatprep.mubr.msk.f32.mxu0 %vm223_vm0, %v117_v36 }
  0xdc   :  { %982 = vmatmul.mubr.msk.f32.gmra.mrb[6].mxu0 %vm223_vm0, %v118_v37 }
  0xdd   :  { %984 = vmatprep.mubr.msk.f32.mxu0 %vm223_vm0, %v119_v38 }
  0xe0   :  { %985 = vmatmul.mubr.msk.f32.gmra.mrb[8].mxu0 %vm223_vm0, %v120_v39  ;;  %v211_v39 = vpop.permute.xlu1 %210 }
  0xe1   :  { %987 = vmatprep.mubr.msk.f32.mxu0 %vm223_vm0, %v121_v40 }
  0xe4   :  { %988 = vmatmul.mubr.msk.f32.gmra.mrb[10].mxu0 %vm223_vm0, %v122_v41  ;;  %v216_v55 = vpop.permute.xlu1 %215 }
  0xe5   :  { %990 = vmatprep.mubr.msk.f32.mxu0 %vm223_vm0, %v123_v42 }
  0xe8   :  { %991 = vmatmul.mubr.msk.f32.gmra.mrb[12].mxu0 %vm223_vm0, %v124_v43 }
  0xe9   :  { %993 = vmatprep.mubr.msk.f32.mxu0 %vm223_vm0, %v125_v44 }
  0xec   :  { %994 = vmatmul.mubr.msk.f32.gmra.mrb[14].mxu0 %vm223_vm0, %v126_v45 }
  0xed   :  { %1028 = vmatprep.mubr.f32.mxu0 %v449_v46 }
 0x1a3   :  { %v974_v6 = vpop.f32.mrb[0].mxu0 }
 0x1a4   :  { %v344_v7 = vadd.f32 %v974_v6, %v151_v53  ;;  %v338_v8 = vpop.f32.mrb[1].mxu0 }
 0x1a5   :  { %v339_v9 = vadd.f32 %v338_v8, %v146_v51 }
 0x1a6   :  { %v418_v10 = vmul.f32 0.2, %v344_v7 }
 0x1a7   :  { %v417_v12 = vmul.f32 0.2, %v339_v9  ;;  %v977_v13 = vpop.f32.mrb[2].mxu0 }
 0x1a8   :  { %v434_v14 = vmax.f32 %v344_v7, %v418_v10  ;;  %v354_v15 = vadd.f32 %v977_v13, %v161_v58  ;;  %v348_v16 = vpop.f32.mrb[3].mxu0 }
 0x1a9   :  { %v433_v17 = vmax.f32 %v339_v9, %v417_v12  ;;  %v349_v18 = vadd.f32 %v348_v16, %v156_v56 }
 0x1aa   :  { %v420_v19 = vmul.f32 0.2, %v354_v15 }
 0x1ab   :  { %v1060_v20 = vpack.c.bf16 %v434_v14, %v433_v17  ;;  %v419_v21 = vmul.f32 0.2, %v349_v18  ;;  %v980_v22 = vpop.f32.mrb[4].mxu0 }
 0x1ac   :  { %v436_v23 = vmax.f32 %v354_v15, %v420_v19  ;;  %v364_v24 = vadd.f32 %v980_v22, %v171_v63  ;;  %v358_v25 = vpop.f32.mrb[5].mxu0  ;;  %v450_v19 = vld [vmem:[%s1523_s3 + $0x8] sm:$0xff]  ;;  %v457_v22 = vld [vmem:[%s1523_s3 + $0x40] sm:$0xff] }
 0x1ad   :  { %v435_v27 = vmax.f32 %v349_v18, %v419_v21  ;;  %v359_v28 = vadd.f32 %v358_v25, %v166_v61  ;;  %1061 = vmatprep.subr.bf16.mxu0 %v1060_v20  ;;  %1092 = vmatprep.subr.bf16.mxu1 %v1060_v20  ;;  %v451_v21 = vld [vmem:[%s1523_s3 + $0x10] sm:$0xff]  ;;  %v453_v25 = vld [vmem:[%s1523_s3 + $0x20] sm:$0xff] }
 0x1ae   :  { %v422_v29 = vmul.f32 0.2, %v364_v24  ;;  %1063 = vmatpush3.bf16.msra.mxu0 %v1060_v20  ;;  %1100 = vmatpush3.bf16.msra.mxu1 %v1060_v20  ;;  %v456_v20 = vld [vmem:[%s1523_s3 + $0x38] sm:$0xff] }
 0x1af   :  { %v1064_v30 = vpack.c.bf16 %v436_v23, %v435_v27  ;;  %v421_v31 = vmul.f32 0.2, %v359_v28  ;;  %v983_v32 = vpop.f32.mrb[6].mxu0  ;;  %v452_v23 = vld [vmem:[%s1523_s3 + $0x18] sm:$0xff]  ;;  %v454_v27 = vld [vmem:[%s1523_s3 + $0x28] sm:$0xff] }
 0x1b0   :  { %v438_v33 = vmax.f32 %v364_v24, %v422_v29  ;;  %v374_v34 = vadd.f32 %v983_v32, %v181_v2  ;;  %v368_v35 = vpop.f32.mrb[7].mxu0  ;;  %v458_v24 = vld [vmem:[%s1523_s3 + $0x48] sm:$0xff]  ;;  %v461_v29 = vld [vmem:[%s1523_s3 + $0x60] sm:$0xff]  ;;  %v464_v32 = vld [vmem:[%s1523_s3 + $0x78] sm:$0xff] }
 0x1b1   :  { %v437_v36 = vmax.f32 %v359_v28, %v421_v31  ;;  %v369_v37 = vadd.f32 %v368_v35, %v176_v1  ;;  %1065 = vmatprep.subr.bf16.mxu0 %v1064_v30  ;;  %1093 = vmatprep.subr.bf16.mxu1 %v1064_v30  ;;  %v460_v28 = vld [vmem:[%s1523_s3 + $0x58] sm:$0xff]  ;;  %v463_v31 = vld [vmem:[%s1523_s3 + $0x70] sm:$0xff] }
 0x1b2   :  { %v424_v38 = vmul.f32 0.2, %v374_v34  ;;  %1067 = vmatpush3.bf16.msra.mxu0 %v1064_v30  ;;  %1101 = vmatpush3.bf16.msra.mxu1 %v1064_v30  ;;  %v462_v30 = vld [vmem:[%s1523_s3 + $0x68] sm:$0xff] }
 0x1b3   :  { %v1068_v40 = vpack.c.bf16 %v438_v33, %v437_v36  ;;  %v423_v41 = vmul.f32 0.2, %v369_v37  ;;  %v986_v42 = vpop.f32.mrb[8].mxu0 }
 0x1b4   :  { %v440_v43 = vmax.f32 %v374_v34, %v424_v38  ;;  %v384_v44 = vadd.f32 %v986_v42, %v191_v4  ;;  %v378_v45 = vpop.f32.mrb[9].mxu0  ;;  %v221_v4 = vpop.permute.xlu1 %220 }
 0x1b5   :  { %v439_v46 = vmax.f32 %v369_v37, %v423_v41  ;;  %v379_v47 = vadd.f32 %v378_v45, %v186_v3  ;;  %1069 = vmatprep.subr.bf16.mxu0 %v1068_v40  ;;  %1094 = vmatprep.subr.bf16.mxu1 %v1068_v40 }
 0x1b6   :  { %v426_v48 = vmul.f32 0.2, %v384_v44  ;;  %1071 = vmatpush3.bf16.msra.mxu0 %v1068_v40  ;;  %1102 = vmatpush3.bf16.msra.mxu1 %v1068_v40 }
 0x1b7   :  { %v1072_v49 = vpack.c.bf16 %v440_v43, %v439_v46  ;;  %v425_v50 = vmul.f32 0.2, %v379_v47  ;;  %v989_v51 = vpop.f32.mrb[10].mxu0  ;;  %v484_v43 = vpop.permute.xlu0 %483 }
 0x1b8   :  { %v442_v52 = vmax.f32 %v384_v44, %v426_v48  ;;  %v394_v53 = vadd.f32 %v989_v51, %v201_v11  ;;  %v388_v54 = vpop.f32.mrb[11].mxu0  ;;  %v489_v33 = vpop.permute.xlu1 %488 }
 0x1b9   :  { %v441_v56 = vmax.f32 %v379_v47, %v425_v50  ;;  %v389_v57 = vadd.f32 %v388_v54, %v1448_v5  ;;  %1073 = vmatprep.subr.bf16.mxu0 %v1072_v49  ;;  %1095 = vmatprep.subr.bf16.mxu1 %v1072_v49 }
 0x1ba   :  { %v428_v58 = vmul.f32 0.2, %v394_v53  ;;  %1075 = vmatpush3.bf16.msra.mxu0 %v1072_v49  ;;  %1103 = vmatpush3.bf16.msra.mxu1 %v1072_v49 }
 0x1bb   :  { %v1076_v59 = vpack.c.bf16 %v442_v52, %v441_v56  ;;  %v427_v60 = vmul.f32 0.2, %v389_v57  ;;  %v992_v61 = vpop.f32.mrb[12].mxu0  ;;  %v777_v45 = vpop.permute.xlu0 %776 }
 0x1bc   :  { %v444_v62 = vmax.f32 %v394_v53, %v428_v58  ;;  %v404_v63 = vadd.f32 %v992_v61, %v211_v39  ;;  %v398_v0 = vpop.f32.mrb[13].mxu0  ;;  %v494_v34 = vpop.permute.xlu1 %493 }
 0x1bd   :  { %v443_v1 = vmax.f32 %v389_v57, %v427_v60  ;;  %v399_v2 = vadd.f32 %v398_v0, %v206_v26  ;;  %1077 = vmatprep.subr.bf16.mxu0 %v1076_v59  ;;  %1096 = vmatprep.subr.bf16.mxu1 %v1076_v59  ;;  %v459_v26 = vld [vmem:[%s1523_s3 + $0x50] sm:$0xff] }
 0x1be   :  { %v430_v3 = vmul.f32 0.2, %v404_v63  ;;  %1079 = vmatpush3.bf16.msra.mxu0 %v1076_v59  ;;  %1104 = vmatpush3.bf16.msra.mxu1 %v1076_v59 }
 0x1bf   :  { %v1080_v5 = vpack.c.bf16 %v444_v62, %v443_v1  ;;  %v429_v6 = vmul.f32 0.2, %v399_v2  ;;  %v995_v7 = vpop.f32.mrb[14].mxu0  ;;  %v1493_v47 = vpop.permute.xlu0 %781 }
 0x1c0   :  { %v446_v8 = vmax.f32 %v404_v63, %v430_v3  ;;  %v414_v9 = vadd.f32 %v995_v7, %v221_v4  ;;  %v408_v10 = vpop.f32.mrb[15].mxu0  ;;  %v499_v35 = vpop.permute.xlu1 %498 }
 0x1c1   :  { %v445_v11 = vmax.f32 %v399_v2, %v429_v6  ;;  %v409_v12 = vadd.f32 %v408_v10, %v216_v55  ;;  %1081 = vmatprep.subr.bf16.mxu0 %v1080_v5  ;;  %1097 = vmatprep.subr.bf16.mxu1 %v1080_v5 }
 0x1c2   :  { %v432_v13 = vmul.f32 0.2, %v414_v9  ;;  %1083 = vmatpush3.bf16.msra.mxu0 %v1080_v5  ;;  %1105 = vmatpush3.bf16.msra.mxu1 %v1080_v5 }
 0x1c3   :  { %v1084_v14 = vpack.c.bf16 %v446_v8, %v445_v11  ;;  %v431_v15 = vmul.f32 0.2, %v409_v12  ;;  %v1495_v49 = vpop.permute.xlu0 %786 }
 0x1c4   :  { %v448_v16 = vmax.f32 %v414_v9, %v432_v13  ;;  %v504_v36 = vpop.permute.xlu1 %503 }
 0x1c5   :  { %v447_v17 = vmax.f32 %v409_v12, %v431_v15  ;;  %1085 = vmatprep.subr.bf16.mxu0 %v1084_v14  ;;  %1098 = vmatprep.subr.bf16.mxu1 %v1084_v14 }
 0x1c6   :  { %1087 = vmatpush3.bf16.msra.mxu0 %v1084_v14  ;;  %1106 = vmatpush3.bf16.msra.mxu1 %v1084_v14 }
 0x1c7   :  { %v1088_v18 = vpack.c.bf16 %v448_v16, %v447_v17  ;;  %v1497_v51 = vpop.permute.xlu0 %791 }
 0x1c8   :  { %v757_v37 = vpop.permute.xlu1 %756 }
 0x1c9   :  { %1089 = vmatprep.subr.bf16.mxu0 %v1088_v18  ;;  %1099 = vmatprep.subr.bf16.mxu1 %v1088_v18 }
 0x1ca   :  { %1091 = vmatpush3.bf16.msra.mxu0 %v1088_v18  ;;  %1107 = vmatpush3.bf16.msra.mxu1 %v1088_v18 }
 0x1cb   :  { %v1499_v59 = vpop.permute.xlu0 %796 }
 0x1cc   :  { %v762_v38 = vpop.permute.xlu1 %761 }
 0x1cd   :  { %1029 = vmatmul.mubr.f32.vlgmr.msra.gmra.mrb[16].mxu0 %v450_v19  ;;  %1038 = vmatmul.mubr.f32.vlgmr.msra.gmra.mrb[0].mxu1 %v456_v20 }
 0x1ce   :  { %1031 = vmatprep.mubr.f32.mxu0 %v451_v21  ;;  %1040 = vmatprep.mubr.f32.mxu1 %v457_v22 }
 0x1cf   :  { %v802_v22 = vpop.permute.xlu0 %801 }
 0x1d0   :  { %v509_v39 = vpop.permute.xlu1 %508 }
 0x1d1   :  { %1032 = vmatmul.mubr.f32.gmra.mrb[18].mxu0 %v452_v23  ;;  %1041 = vmatmul.mubr.f32.gmra.mrb[2].mxu1 %v458_v24 }
 0x1d2   :  { %1034 = vmatprep.mubr.f32.mxu0 %v453_v25  ;;  %1043 = vmatprep.mubr.f32.mxu1 %v459_v26 }
 0x1d4   :  { %v767_v40 = vpop.permute.xlu1 %766 }
 0x1d5   :  { %1035 = vmatmul.mubr.f32.gmra.mrb[20].mxu0 %v454_v27  ;;  %1044 = vmatmul.mubr.f32.gmra.mrb[4].mxu1 %v460_v28 }
 0x1d6   :  { %1046 = vmatprep.mubr.f32.mxu1 %v461_v29 }
 0x1d8   :  { %v514_v41 = vpop.permute.xlu1 %513 }
 0x1d9   :  { %1047 = vmatmul.mubr.f32.gmra.mrb[6].mxu1 %v462_v30 }
 0x1da   :  { %1049 = vmatprep.mubr.f32.mxu1 %v463_v31 }
 0x1dc   :  { %v772_v42 = vpop.permute.xlu1 %771 }
 0x1dd   :  { %1050 = vmatmul.mubr.f32.gmra.mrb[8].mxu1 %v464_v32 }
 0x1e0   :  { %v519_v44 = vpop.permute.xlu1 %518 }
 0x1e4   :  { %v524_v46 = vpop.permute.xlu1 %523 }
 0x1e8   :  { %v529_v48 = vpop.permute.xlu1 %528 }
 0x1ec   :  { %v534_v50 = vpop.permute.xlu1 %533 }
 0x1f0   :  { %v539_v52 = vpop.permute.xlu1 %538 }
 0x1f4   :  { %v544_v6 = vpop.permute.xlu1 %543 }
 0x1f8   :  { %v549_v29 = vpop.permute.xlu1 %548 }
 0x2a0   :  { %v1030_v53 = vpop.f32.mrb[16].mxu0  ;;  %v1039_v54 = vpop.f32.mrb[0].mxu1 }
 0x2a1   :  { %v633_v55 = vadd.f32 %v1030_v53, %v489_v33  ;;  %v627_v56 = vpop.f32.mrb[17].mxu0  ;;  %v657_v57 = vpop.f32.mrb[1].mxu1  ;;  %v663_v14 = vadd.f32 %v1039_v54, %v519_v44 }
 0x2a2   :  { %v628_v58 = vadd.f32 %v627_v56, %v484_v43  ;;  %v658_v10 = vadd.f32 %v657_v57, %v514_v41 }
 0x2a3   :  { %v707_v60 = vmul.f32 0.2, %v633_v55  ;;  %v713_v30 = vmul.f32 0.2, %v663_v14 }
 0x2a4   :  { %v706_v61 = vmul.f32 0.2, %v628_v58  ;;  %v1033_v62 = vpop.f32.mrb[18].mxu0  ;;  %v1042_v63 = vpop.f32.mrb[2].mxu1  ;;  %v712_v25 = vmul.f32 0.2, %v658_v10 }
 0x2a5   :  { %v723_v0 = vmax.f32 %v633_v55, %v707_v60  ;;  %v643_v1 = vadd.f32 %v1033_v62, %v499_v35  ;;  %v637_v2 = vpop.f32.mrb[19].mxu0  ;;  %v667_v3 = vpop.f32.mrb[3].mxu1  ;;  %v673_v31 = vadd.f32 %v1042_v63, %v529_v48 }
 0x2a6   :  { %v722_v4 = vmax.f32 %v628_v58, %v706_v61  ;;  %v638_v5 = vadd.f32 %v637_v2, %v494_v34  ;;  %v668_v23 = vadd.f32 %v667_v3, %v524_v46  ;;  %v807_v46 = vpop.permute.xlu0 %806  ;;  %v554_v48 = vpop.permute.xlu1 %553 }
 0x2a7   :  { %v835_v7 = vmul.f32 %v762_v38, %v723_v0  ;;  %v709_v8 = vmul.f32 0.2, %v643_v1  ;;  %v715_v53 = vmul.f32 0.2, %v673_v31 }
 0x2a8   :  { %v834_v9 = vmul.f32 %v757_v37, %v722_v4  ;;  %v708_v11 = vmul.f32 0.2, %v638_v5  ;;  %v1036_v12 = vpop.f32.mrb[20].mxu0  ;;  %v1045_v13 = vpop.f32.mrb[4].mxu1  ;;  %v714_v38 = vmul.f32 0.2, %v668_v23 }
 0x2a9   :  { %v653_v15 = vadd.f32 %v1036_v12, %v509_v39  ;;  %v647_v16 = vpop.f32.mrb[21].mxu0  ;;  %v677_v17 = vpop.f32.mrb[5].mxu1  ;;  %v725_v19 = vmax.f32 %v643_v1, %v709_v8  ;;  %v728_v39 = vmax.f32 %v658_v10, %v712_v25  ;;  %v683_v56 = vadd.f32 %v1045_v13, %v539_v52 }
 0x2aa   :  { %v850_v18 = vadd.f32 %v835_v7, %v834_v9  ;;  %v724_v20 = vmax.f32 %v638_v5, %v708_v11  ;;  %v648_v21 = vadd.f32 %v647_v16, %v504_v36  ;;  %v678_v36 = vadd.f32 %v677_v17, %v534_v50  ;;  %v812_v2 = vpop.permute.xlu0 %811  ;;  %v559_v7 = vpop.permute.xlu1 %558 }
 0x2ab   :  { %v711_v24 = vmul.f32 0.2, %v653_v15  ;;  %v837_v33 = vmul.f32 %v772_v42, %v725_v19  ;;  %v730_v58 = vmax.f32 %v668_v23, %v714_v38  ;;  %v840_v42 = vmul.f32 %v1495_v49, %v728_v39 }
 0x2ac   :  { %v836_v26 = vmul.f32 %v767_v40, %v724_v20  ;;  %v710_v27 = vmul.f32 0.2, %v648_v21  ;;  %v1048_v28 = vpop.f32.mrb[6].mxu1  ;;  %v729_v40 = vmax.f32 %v663_v14, %v713_v30  ;;  %v716_v61 = vmul.f32 0.2, %v678_v36 }
 0x2ad   :  { %v687_v32 = vpop.f32.mrb[7].mxu1  ;;  %v727_v35 = vmax.f32 %v653_v15, %v711_v24  ;;  %v731_v63 = vmax.f32 %v673_v31, %v715_v53  ;;  %v717_v50 = vmul.f32 0.2, %v683_v56  ;;  %v693_v1 = vadd.f32 %v1048_v28, %v549_v29 }
 0x2ae   :  { %v851_v34 = vadd.f32 %v850_v18, %v836_v26  ;;  %v726_v37 = vmax.f32 %v648_v21, %v710_v27  ;;  %v688_v62 = vadd.f32 %v687_v32, %v544_v6  ;;  %v842_v3 = vmul.f32 %v1499_v59, %v730_v58  ;;  %v817_v14 = vpop.permute.xlu0 %816  ;;  %v822_v59 = vpop.permute.xlu1 %821 }
 0x2af   :  { %v839_v55 = vmul.f32 %v1493_v47, %v727_v35  ;;  %v732_v4 = vmax.f32 %v678_v36, %v716_v61  ;;  %v843_v8 = vmul.f32 %v802_v22, %v731_v63  ;;  %v733_v9 = vmax.f32 %v683_v56, %v717_v50 }
 0x2b0   :  { %v838_v41 = vmul.f32 %v777_v45, %v726_v37  ;;  %v852_v43 = vadd.f32 %v851_v34, %v837_v33  ;;  %v1051_v44 = vpop.f32.mrb[8].mxu1  ;;  %v841_v45 = vmul.f32 %v1497_v51, %v729_v40  ;;  %v718_v52 = vmul.f32 0.2, %v688_v62 }
 0x2b1   :  { %v697_v54 = vpop.f32.mrb[9].mxu1  ;;  %v719_v10 = vmul.f32 0.2, %v693_v1  ;;  %v703_v11 = vadd.f32 %v1051_v44, %v559_v7  ;;  %v844_v6 = vmul.f32 %v807_v46, %v732_v4  ;;  %v845_v15 = vmul.f32 %v812_v2, %v733_v9 }
 0x2b2   :  { %v853_v57 = vadd.f32 %v852_v43, %v838_v41  ;;  %v698_v5 = vadd.f32 %v697_v54, %v554_v48  ;;  %v734_v13 = vmax.f32 %v688_v62, %v718_v52  ;;  %v827_v25 = vpop.permute.xlu0 %826  ;;  %v832_v28 = vpop.permute.xlu1 %831  ;;  %v872_v38 = vstv %s1526_s6 }
 0x2b3   :  { %v735_v17 = vmax.f32 %v693_v1, %v719_v10  ;;  %v721_v18 = vmul.f32 0.2, %v703_v11 }
 0x2b4   :  { %v854_v60 = vadd.f32 %v853_v57, %v839_v55  ;;  %v720_v51 = vmul.f32 0.2, %v698_v5  ;;  %v846_v19 = vmul.f32 %v817_v14, %v734_v13 }
 0x2b5   :  { %v847_v23 = vmul.f32 %v822_v59, %v735_v17  ;;  %v737_v22 = vmax.f32 %v703_v11, %v721_v18 }
 0x2b6   :  { %v855_v0 = vadd.f32 %v854_v60, %v840_v42  ;;  %v736_v21 = vmax.f32 %v698_v5, %v720_v51 }
 0x2b7   :  { %v849_v29 = vmul.f32 %v832_v28, %v737_v22 }
 0x2b8   :  { %v856_v47 = vadd.f32 %v855_v0, %v841_v45  ;;  %v848_v26 = vmul.f32 %v827_v25, %v736_v21 }
 0x2ba   :  { %v857_v49 = vadd.f32 %v856_v47, %v842_v3 }
 0x2bc   :  { %v858_v12 = vadd.f32 %v857_v49, %v843_v8 }
 0x2be   :  { %v859_v16 = vadd.f32 %v858_v12, %v844_v6 }
 0x2c0   :  { %v860_v20 = vadd.f32 %v859_v16, %v845_v15 }
 0x2c2   :  { %v861_v24 = vadd.f32 %v860_v20, %v846_v19 }
 0x2c4   :  { %v862_v27 = vadd.f32 %v861_v24, %v847_v23 }
 0x2c6   :  { %v863_v30 = vadd.f32 %v862_v27, %v848_v26 }
 0x2c8   :  { %v864_v31 = vadd.f32 %v863_v30, %v849_v29 }
 0x2ca   :  { %v865_v32 = vrot.slane %v864_v31, 4 }
 0x2cc   :  { %v866_v33 = vadd.f32 %v865_v32, %v864_v31 }
 0x2ce   :  { %v867_v34 = vrot.slane %v866_v33, 2 }
 0x2d0   :  { %v868_v35 = vadd.f32 %v867_v34, %v866_v33 }
 0x2d2   :  { %v869_v37 = vrot.slane %v868_v35, 1 }
 0x2d4   :  { %v870_v39 = vadd.f32 %v869_v37, %v868_v35 }
 0x2d6   :  { %v873_v41 = vadd.f32 %v872_v38, %v870_v39 }
 0x2d8   :  { %v911_v43 = vmul.f32 -1.442695, %v873_v41 }
 0x2da   :  { %1114 = vpow2.f32 %v911_v43 }
 0x2e4   :  { %v1115_v36 = vpop.eup %1114 }
 0x2e5   :  { %v877_v44 = vadd.f32 1.0, %v1115_v36 }
 0x2e7   :  { %1116 = vrcp.f32 %v877_v44 }
 0x2f1   :  { %v1117_v46 = vpop.eup %1116 }
 0x2f2   :  { %880 = vst [vmem:[#allocation3] sm:$0x1] %v1117_v46 }
 0x2f3   :  { %1129 = shalt.err (!%p1126_p4)
}
 0x2f4   :  { %s1130_s22 = scalar_lea.hbm %s1527_s7, 16 }
 0x2f5   :  { %p1131_p5 = scmp.ne.s32.totalorder %s1527_s7, %s1130_s22  ;;  %p1134_p6 = scmp.lt.u32.totalorder %s1130_s22, %s1527_s7 }
 0x2f7   :  { %p1136_p7 = pnand %p1134_p6, %p1131_p5 }
 0x2f9   :  { %1139 = shalt.err (!%p1136_p7)
}
 0x2fa   :  { %890 = dma.vmem_to_hbm [thread:$0]  %s888_s18, 16, %s1527_s7, [#allocation4]  }
 0x2fb   :  { %1140 = dma.done.wait [#allocation4], 16  }
 0x2fc   :  { %1141 = vsyncadd [#allocation4], 4294967280 }
 0x2fd   :  { %894 = vsyncpa [#allocation4], 1 }

</bundles_post_ra>
